<compile_context>
chip_gen: v7x
topology: tpu7x:2x2x1
jax: 0.10.0
libtpu: 0.0.40
codegen_flags: <defaults>
</compile_context>

<pallas_src>
import functools

import jax
import jax.numpy as jnp
from jax import lax
from jax.experimental import pallas as pl
from jax.experimental.pallas import tpu as pltpu


def _round_up(x: int, mult: int) -> int:
    return (x + mult - 1) // mult * mult


def _rbf_kernel_body(x_ref, y_ref, xsq_ref, ysq_ref, o_ref, *, two_c):
    # x_ref: (tm, d)  y_ref: (tn, d)  xsq_ref: (tm, 1)  ysq_ref: (1, tn)
    # xsq/ysq already hold -c * ||row||^2, with c = 1 / (2 * sigma^2 * s^2).
    xy = lax.dot_general(
        x_ref[...],
        y_ref[...],
        dimension_numbers=(((1,), (1,)), ((), ())),   # contract last dims, no transpose
        preferred_element_type=jnp.float32,
    )  # (tm, tn) f32 on the MXU

    # exponent = -c * (||x||^2 + ||y||^2 - 2 x.y)
    arg = xsq_ref[...] + ysq_ref[...] + two_c * xy
    # d2 >= 0 so the exponent must be <= 0; clamp numerical positives coming
    # from cancellation in the Gram trick.
    o_ref[...] = jnp.exp(jnp.minimum(arg, 0.0)).astype(o_ref.dtype)


def rbf_pallas(X, Y, sigma=1.0, *, tm=128, tn=128):
    """X: (n, s, s), Y: (m, s, s)  ->  (n, m) float32 RBF kernel matrix."""
    n, s, sx2 = X.shape
    m, sy, sy2 = Y.shape
    assert s == sx2 == sy == sy2, "X and Y must share spatial size s"
    d = s * s

    # Fold both scalar scales into one constant.
    c = 1.0 / (2.0 * float(sigma) ** 2 * float(s) ** 2)
    two_c = 2.0 * c

    Xf = X.reshape(n, d)   # keep native dtype for the MXU operands
    Yf = Y.reshape(m, d)

    # Row norms precomputed once (f32 accumulation), pre-scaled by -c so the
    # kernel epilogue is just adds + one mul + exp.
    x_sq = (-c) * jnp.sum(Xf.astype(jnp.float32) ** 2, axis=-1, keepdims=True)        # (n, 1)
    y_sq = (-c) * jnp.sum(Yf.astype(jnp.float32) ** 2, axis=-1, keepdims=True).T      # (1, m)

    # Tile sizes: lane-dense output (tn multiple of 128), sublane-aligned rows.
    tm_eff = min(tm, _round_up(n, 8))
    tn_eff = min(tn, _round_up(m, 128))
    n_p = _round_up(n, tm_eff)
    m_p = _round_up(m, tn_eff)
    d_p = _round_up(d, 128)

    # Zero-pad (zeros don't change dot products; padded rows/cols are sliced off).
    Xf = jnp.pad(Xf, ((0, n_p - n), (0, d_p - d)))
    Yf = jnp.pad(Yf, ((0, m_p - m), (0, d_p - d)))
    x_sq = jnp.pad(x_sq, ((0, n_p - n), (0, 0)))
    y_sq = jnp.pad(y_sq, ((0, 0), (0, m_p - m)))

    grid = (n_p // tm_eff, m_p // tn_eff)

    kernel = functools.partial(_rbf_kernel_body, two_c=two_c)

    bytes_accessed = (
        Xf.size * Xf.dtype.itemsize
        + Yf.size * Yf.dtype.itemsize
        + x_sq.size * 4
        + y_sq.size * 4
        + n_p * m_p * 4
    )

    out_padded = pl.pallas_call(
        kernel,
        out_shape=jax.ShapeDtypeStruct((n_p, m_p), jnp.float32),
        grid=grid,
        in_specs=[
            pl.BlockSpec((tm_eff, d_p), lambda i, j: (i, 0)),   # X tile (rows i)
            pl.BlockSpec((tn_eff, d_p), lambda i, j: (j, 0)),   # Y tile (rows j)
            pl.BlockSpec((tm_eff, 1), lambda i, j: (i, 0)),     # -c * ||x||^2
            pl.BlockSpec((1, tn_eff), lambda i, j: (0, j)),     # -c * ||y||^2
        ],
        out_specs=pl.BlockSpec((tm_eff, tn_eff), lambda i, j: (i, j)),
        compiler_params=pltpu.CompilerParams(
            dimension_semantics=("parallel", "parallel"),
        ),
        cost_estimate=pl.CostEstimate(
            flops=2 * n_p * m_p * d_p,
            transcendentals=n_p * m_p,
            bytes_accessed=bytes_accessed,
        ),
    )(Xf, Yf, x_sq, y_sq)

    return out_padded[:n, :m]


def rbf_reference(X, Y, sigma=1.0):
    n, s, _ = X.shape
    m = Y.shape[0]
    Xf = X.reshape(n, s * s).astype(jnp.float32)
    Yf = Y.reshape(m, s * s).astype(jnp.float32)
    diff = Xf[:, None, :] - Yf[None, :, :]
    d2 = jnp.sum(diff * diff, axis=-1)
    fnorms = d2 / (s * s)
    return jnp.exp(-fnorms / (2.0 * sigma ** 2))


if __name__ == "__main__":
    key = jax.random.PRNGKey(0)
    kx, ky = jax.random.split(key)

    n, m, s = 8, 16, 16   # X: (8, 16, 16), Y: (16, 16, 16)
    sigma = 1.0

    X = jax.random.normal(kx, (n, s, s), dtype=jnp.float32)
    Y = jax.random.normal(ky, (m, s, s), dtype=jnp.float32)

    out = rbf_pallas(X, Y, sigma=sigma)
    out = jax.block_until_ready(out)

    ref = rbf_reference(X, Y, sigma=sigma)
    assert out.shape == (n, m)
    assert jnp.allclose(out, ref, atol=1e-5, rtol=1e-5), "mismatch vs reference"

    print("KERNEL_OK")
</pallas_src>

<mosaic_0001>
module attributes {stable_mosaic.version = 11 : i64} {
  func.func @_rbf_kernel_body(%arg0: i32, %arg1: i32, %arg2: memref<8x256xf32, #tpu.memory_space<vmem>>, %arg3: memref<128x256xf32, #tpu.memory_space<vmem>>, %arg4: memref<8x1xf32, #tpu.memory_space<vmem>>, %arg5: memref<1x128xf32, #tpu.memory_space<vmem>>, %arg6: memref<8x128xf32, #tpu.memory_space<vmem>>) attributes {dimension_semantics = [#tpu.dimension_semantics<parallel>, #tpu.dimension_semantics<parallel>], iteration_bounds = array<i64: 1, 1>, scalar_prefetch = 0 : i64, scratch_operands = 0 : i64, tpu.core_type = #tpu.core_type<tc>, window_params = [{transform_indices = @transform_0, window_bounds = array<i64: 8, 256>}, {transform_indices = @transform_1, window_bounds = array<i64: 128, 256>}, {transform_indices = @transform_2, window_bounds = array<i64: 8, 1>}, {transform_indices = @transform_3, window_bounds = array<i64: 1, 128>}, {transform_indices = @transform_4, window_bounds = array<i64: 8, 128>}]} {
    %c0 = arith.constant 0 : index
    %c0_0 = arith.constant 0 : index
    %0 = vector.load %arg2[%c0, %c0_0] : memref<8x256xf32, #tpu.memory_space<vmem>>, vector<8x256xf32>
    %c0_1 = arith.constant 0 : index
    %c0_2 = arith.constant 0 : index
    %1 = vector.load %arg3[%c0_1, %c0_2] : memref<128x256xf32, #tpu.memory_space<vmem>>, vector<128x256xf32>
    %cst = arith.constant dense<0.000000e+00> : vector<8x128xf32>
    %2 = tpu.matmul %0, %1, %cst {dimension_numbers = #tpu.dot_dimension_numbers<[1], [1], [0], [0], [0, 0, 1, 0], [], []>} : vector<8x256xf32>, vector<128x256xf32>, vector<8x128xf32> -> vector<8x128xf32>
    %c0_3 = arith.constant 0 : index
    %c0_4 = arith.constant 0 : index
    %3 = vector.load %arg4[%c0_3, %c0_4] : memref<8x1xf32, #tpu.memory_space<vmem>>, vector<8x1xf32>
    %c0_5 = arith.constant 0 : index
    %c0_6 = arith.constant 0 : index
    %4 = vector.load %arg5[%c0_5, %c0_6] : memref<1x128xf32, #tpu.memory_space<vmem>>, vector<1x128xf32>
    %5 = vector.broadcast %3 : vector<8x1xf32> to vector<8x128xf32>
    %6 = vector.broadcast %4 : vector<1x128xf32> to vector<8x128xf32>
    %7 = arith.addf %5, %6 : vector<8x128xf32>
    %cst_7 = arith.constant 3.906250e-03 : f32
    %8 = vector.broadcast %cst_7 : f32 to vector<8x128xf32>
    %9 = arith.mulf %8, %2 : vector<8x128xf32>
    %10 = arith.addf %7, %9 : vector<8x128xf32>
    %cst_8 = arith.constant 0.000000e+00 : f32
    %11 = vector.broadcast %cst_8 : f32 to vector<8x128xf32>
    %12 = arith.minimumf %10, %11 : vector<8x128xf32>
    %13 = math.exp %12 : vector<8x128xf32>
    %c0_9 = arith.constant 0 : index
    %c0_10 = arith.constant 0 : index
    %14 = vector.load %arg6[%c0_9, %c0_10] : memref<8x128xf32, #tpu.memory_space<vmem>>, vector<8x128xf32>
    tpu.vector_store %arg6[%c0_9, %c0_10], %13 {strides = array<i32>} : memref<8x128xf32, #tpu.memory_space<vmem>>, vector<8x128xf32>,
    return
  }
  func.func @transform_0(%arg0: i32, %arg1: i32) -> (i32, i32) {
    %c0_i32 = arith.constant 0 : i32
    %c0_i32_0 = arith.constant 0 : i32
    return %arg0, %c0_i32 : i32, i32
  }
  func.func @transform_1(%arg0: i32, %arg1: i32) -> (i32, i32) {
    %c0_i32 = arith.constant 0 : i32
    %c0_i32_0 = arith.constant 0 : i32
    return %arg1, %c0_i32 : i32, i32
  }
  func.func @transform_2(%arg0: i32, %arg1: i32) -> (i32, i32) {
    %c0_i32 = arith.constant 0 : i32
    %c0_i32_0 = arith.constant 0 : i32
    return %arg0, %c0_i32 : i32, i32
  }
  func.func @transform_3(%arg0: i32, %arg1: i32) -> (i32, i32) {
    %c0_i32 = arith.constant 0 : i32
    %c0_i32_0 = arith.constant 0 : i32
    return %c0_i32, %arg1 : i32, i32
  }
  func.func @transform_4(%arg0: i32, %arg1: i32) -> (i32, i32) {
    %c0_i32 = arith.constant 0 : i32
    return %arg0, %arg1 : i32, i32
  }
}

</mosaic_0001>

<bundles_post_ra>
// kernel: tpu_custom_call.1
= control target key start
LH: loop header
LB: loop body
LE: loop exit
PB: predicated region body
PF: predicated region fallthrough
CT: control target
= control target key end

     0   :  { %9 = vsyncpa [#allocation3], 0  ;;  %s378_s0 = inlined_call_operand.hbm [shape: f32[8,256], index: 0, kind: input, shape index: {}]   ;;  %s379_s1 = inlined_call_operand.hbm [shape: f32[128,256], index: 1, kind: input, shape index: {}]   ;;  %s380_s2 = inlined_call_operand.vmem [shape: f32[8,1], index: 2, kind: input, shape index: {}]   ;;  %s381_s3 = inlined_call_operand.vmem [shape: f32[1,128], index: 3, kind: input, shape index: {}]   ;;  %s382_s4 = inlined_call_operand.hbm [shape: f32[8,128], index: 4, kind: output, shape index: {}]  }
   0x1   :  { %10 = vsyncpa [#allocation6], 0 }
   0x2   :  { %11 = vsyncpa [#allocation4], 0  ;;  %s298_s15 = smov [#allocation2]   ;;  %s299_s17 = smov [#allocation5]  }
   0x3   :  { %s18_s16 = sshll.u32 %s298_s15, 4  ;;  %s27_s18 = sshll.u32 %s299_s17, 4  ;;  %s19_s16 = int_to_ptr.vmem [resolvable:$true] %s18_s16  ;;  %s329_s18 = int_to_ptr.vmem [resolvable:$true] %s27_s18 }
   0x4   :  { %s226_s21 = scalar_lea.hbm %s378_s0, 256 }
   0x5   :  { %p227_p0 = scmp.ne.s32.totalorder %s378_s0, %s226_s21  ;;  %p230_p1 = scmp.lt.u32.totalorder %s226_s21, %s378_s0 }
   0x7   :  { %p232_p2 = pnand %p230_p1, %p227_p0 }
   0x9   :  { %235 = shalt.err (!%p232_p2)
}
   0xa   :  { %s236_s26 = scalar_lea.vmem %s19_s16, 256  ;;  %p241_p4 = scmp.lt.s32.totalorder %s19_s16, %s19_s16 }
   0xb   :  { %p237_p3 = scmp.ne.s32.totalorder %s19_s16, %s236_s26  ;;  %p242_p5 = scmp.lt.s32.totalorder %s236_s26, %s236_s26 }
   0xd   :  { %p243_p6 = por %p242_p5, %p241_p4 }
   0xf   :  { %p244_p7 = pnand %p243_p6, %p237_p3 }
  0x11   :  { %247 = shalt.err (!%p244_p7)
}
  0x12   :  { %21 = dma.hbm_to_vmem [thread:$0]  %s378_s0, 256, %s19_s16, [#allocation3]  }
  0x13   :  { %s248_s5 = scalar_lea.hbm %s379_s1, 4096 }
  0x14   :  { %p249_p8 = scmp.ne.s32.totalorder %s379_s1, %s248_s5  ;;  %p252_p9 = scmp.lt.u32.totalorder %s248_s5, %s379_s1 }
  0x16   :  { %p254_p10 = pnand %p252_p9, %p249_p8 }
  0x18   :  { %257 = shalt.err (!%p254_p10)
}
  0x19   :  { %s258_s10 = scalar_lea.vmem %s329_s18, 4096  ;;  %p263_p12 = scmp.lt.s32.totalorder %s329_s18, %s329_s18 }
  0x1a   :  { %p259_p11 = scmp.ne.s32.totalorder %s329_s18, %s258_s10  ;;  %p264_p13 = scmp.lt.s32.totalorder %s258_s10, %s258_s10 }
  0x1c   :  { %p265_p0 = por %p264_p13, %p263_p12 }
  0x1e   :  { %p266_p1 = pnand %p265_p0, %p259_p11 }
  0x20   :  { %269 = shalt.err (!%p266_p1)
}
  0x21   :  { %s300_s0 = smov 256   ;;  %s301_s11 = smov 16  }
  0x22   :  { %33 = dma.hbm_to_vmem [thread:$0]  %s379_s1, 4096, %s329_s18, [#allocation6], %s300_s0, %s300_s0, %s301_s11  }
  0x23   :  { %292 = dma.done.wait [#allocation3], 256  }
  0x24   :  { %293 = vsyncadd [#allocation3], 4294967040 }
  0x25   :  { %294 = dma.done.wait [#allocation6], 4096  }
  0x26   :  { %295 = vsyncadd [#allocation6], 4294963200  ;;  %v302_v0 = vmov 0   ;;  %v47_v1 = vld [vmem:[#allocation5 + $0x8] sm:$0xff]  ;;  %v49_v2 = vld [vmem:[#allocation5 + $0x18] sm:$0xff]  ;;  %s303_s16 = smov [#allocation7]  }
  0x27   :  { %223 = vset.pattern.permute.xlu0 %v302_v0  ;;  %v46_v3 = vld [vmem:[#allocation5] sm:$0xff]  ;;  %v185_v4 = vpack.c.bf16 %v49_v2, %v47_v1  ;;  %v48_v5 = vld [vmem:[#allocation5 + $0x10] sm:$0xff]  ;;  %v51_v6 = vld [vmem:[#allocation5 + $0x28] sm:$0xff]  ;;  %s174_s17 = sshll.u32 %s303_s16, 4  ;;  %s175_s17 = int_to_ptr.vmem [resolvable:$true] %s174_s17 }
  0x28   :  { %v53_v7 = vld [vmem:[#allocation5 + $0x38] sm:$0xff]  ;;  %v187_v8 = vpack.c.bf16 %v48_v5, %v46_v3  ;;  %v50_v10 = vld [vmem:[#allocation5 + $0x20] sm:$0xff]  ;;  %v52_v11 = vld [vmem:[#allocation5 + $0x30] sm:$0xff]  ;;  %s270_s18 = scalar_lea.vmem %s175_s17, 128  ;;  %p275_p3 = scmp.lt.s32.totalorder %s175_s17, %s175_s17 }
  0x29   :  { %v189_v9 = vpack.c.bf16 %v53_v7, %v51_v6  ;;  %186 = vmatprep.subr.bf16.mxu0 %v185_v4  ;;  %v55_v12 = vld [vmem:[#allocation5 + $0x48] sm:$0xff]  ;;  %v57_v13 = vld [vmem:[#allocation5 + $0x58] sm:$0xff]  ;;  %v191_v14 = vpack.c.bf16 %v52_v11, %v50_v10  ;;  %v148_v17 = vld [vmem:[%s380_s2] sm:$0xff]  ;;  %p271_p2 = scmp.ne.s32.totalorder %s175_s17, %s270_s18  ;;  %p276_p4 = scmp.lt.s32.totalorder %s270_s18, %s270_s18 }
  0x2a   :  { %188 = vmatpush1.bf16.xpose.msra.mxu0 %v187_v8  ;;  %v193_v15 = vpack.c.bf16 %v57_v13, %v55_v12  ;;  %v45_v16 = vld [vmem:[#allocation2 + $0x8] sm:$0xff]  ;;  %152 = vperm.xlu0 %223, %v148_v17   ;;  %v54_v18 = vld [vmem:[#allocation5 + $0x40] sm:$0xff]  ;;  %v56_v19 = vld [vmem:[#allocation5 + $0x50] sm:$0xff] }
  0x2b   :  { %190 = vmatprep.subr.bf16.mxu0 %v189_v9  ;;  %142 = vmatprep.mubr.f32.mxu0 %v45_v16  ;;  %v59_v20 = vld [vmem:[#allocation5 + $0x68] sm:$0xff]  ;;  %v61_v21 = vld [vmem:[#allocation5 + $0x78] sm:$0xff]  ;;  %v195_v22 = vpack.c.bf16 %v56_v19, %v54_v18  ;;  %v58_v24 = vld [vmem:[#allocation5 + $0x60] sm:$0xff]  ;;  %p277_p5 = por %p276_p4, %p275_p3 }
  0x2c   :  { %v197_v23 = vpack.c.bf16 %v61_v21, %v59_v20  ;;  %v60_v25 = vld [vmem:[#allocation5 + $0x70] sm:$0xff]  ;;  %v63_v26 = vld [vmem:[#allocation5 + $0x88] sm:$0xff]  ;;  %v65_v27 = vld [vmem:[#allocation5 + $0x98] sm:$0xff] }
  0x2d   :  { %v199_v28 = vpack.c.bf16 %v60_v25, %v58_v24  ;;  %v201_v29 = vpack.c.bf16 %v65_v27, %v63_v26  ;;  %v62_v30 = vld [vmem:[#allocation5 + $0x80] sm:$0xff]  ;;  %v64_v31 = vld [vmem:[#allocation5 + $0x90] sm:$0xff]  ;;  %v67_v32 = vld [vmem:[#allocation5 + $0xa8] sm:$0xff]  ;;  %p278_p6 = pnand %p277_p5, %p271_p2 }
  0x2e   :  { %v69_v33 = vld [vmem:[#allocation5 + $0xb8] sm:$0xff]  ;;  %v203_v34 = vpack.c.bf16 %v64_v31, %v62_v30  ;;  %v66_v36 = vld [vmem:[#allocation5 + $0xa0] sm:$0xff]  ;;  %v68_v37 = vld [vmem:[#allocation5 + $0xb0] sm:$0xff] }
  0x2f   :  { %v205_v35 = vpack.c.bf16 %v69_v33, %v67_v32  ;;  %v71_v38 = vld [vmem:[#allocation5 + $0xc8] sm:$0xff]  ;;  %v73_v39 = vld [vmem:[#allocation5 + $0xd8] sm:$0xff]  ;;  %v207_v40 = vpack.c.bf16 %v68_v37, %v66_v36  ;;  %v70_v42 = vld [vmem:[#allocation5 + $0xc0] sm:$0xff] }
  0x30   :  { %v209_v41 = vpack.c.bf16 %v73_v39, %v71_v38  ;;  %v72_v43 = vld [vmem:[#allocation5 + $0xd0] sm:$0xff]  ;;  %v75_v44 = vld [vmem:[#allocation5 + $0xe8] sm:$0xff]  ;;  %v77_v45 = vld [vmem:[#allocation5 + $0xf8] sm:$0xff] }
  0x31   :  { %v211_v46 = vpack.c.bf16 %v72_v43, %v70_v42  ;;  %v213_v47 = vpack.c.bf16 %v77_v45, %v75_v44  ;;  %v74_v48 = vld [vmem:[#allocation5 + $0xe0] sm:$0xff]  ;;  %v76_v49 = vld [vmem:[#allocation5 + $0xf0] sm:$0xff] }
  0x32   :  { %192 = vmatpush1.bf16.xpose.msra.mxu0 %v191_v14  ;;  %v215_v50 = vpack.c.bf16 %v76_v49, %v74_v48  ;;  %v44_v51 = vld [vmem:[#allocation2] sm:$0xff] }
  0x33   :  { %194 = vmatprep.subr.bf16.mxu0 %v193_v15  ;;  %v184_v52 = vld [vmem:[%s381_s3] ss:$0 sm:$0xff] }
  0x3a   :  { %196 = vmatpush1.bf16.xpose.msra.mxu0 %v195_v22 }
  0x3b   :  { %198 = vmatprep.subr.bf16.mxu0 %v197_v23 }
  0x42   :  { %200 = vmatpush1.bf16.xpose.msra.mxu0 %v199_v28 }
  0x43   :  { %202 = vmatprep.subr.bf16.mxu0 %v201_v29 }
  0x4a   :  { %204 = vmatpush1.bf16.xpose.msra.mxu0 %v203_v34 }
  0x4b   :  { %206 = vmatprep.subr.bf16.mxu0 %v205_v35 }
  0x52   :  { %208 = vmatpush1.bf16.xpose.msra.mxu0 %v207_v40 }
  0x53   :  { %210 = vmatprep.subr.bf16.mxu0 %v209_v41 }
  0x5a   :  { %212 = vmatpush1.bf16.xpose.msra.mxu0 %v211_v46 }
  0x5b   :  { %214 = vmatprep.subr.bf16.mxu0 %v213_v47 }
  0x62   :  { %216 = vmatpush1.bf16.xpose.msra.mxu0 %v215_v50 }
  0x69   :  { %143 = vmatmul.mubr.f32.vlgmr.msra.gmra.mrb[0].mxu0 %v44_v51 }
  0xa9   :  { %v153_v53 = vpop.permute.xlu0 %152 }
  0xaa   :  { %v161_v54 = vadd.f32 %v184_v52, %v153_v53 }
 0x13c   :  { %v144_v55 = vpop.f32.mrb[0].mxu0 }
 0x13d   :  { %v162_v56 = vmul.f32 0.00390625, %v144_v55  ;;  %v146_v57 = vpop.f32.mrb[1].mxu0 }
 0x13f   :  { %v163_v58 = vadd.f32 %v162_v56, %v161_v54 }
 0x141   :  { %v164_v59 = vmin.f32 %v163_v58, 0.0 }
 0x143   :  { %v165_v60 = vmul.f32 1.442695, %v164_v59 }
 0x145   :  { %224 = vpow2.f32 %v165_v60 }
 0x14f   :  { %v225_v61 = vpop.eup %224 }
 0x150   :  { %167 = vst [vmem:[#allocation7] sm:$0xff] %v225_v61 }
 0x151   :  { %281 = shalt.err (!%p278_p6)
}
 0x152   :  { %s282_s20 = scalar_lea.hbm %s382_s4, 128 }
 0x153   :  { %p283_p7 = scmp.ne.s32.totalorder %s382_s4, %s282_s20  ;;  %p286_p8 = scmp.lt.u32.totalorder %s282_s20, %s382_s4 }
 0x155   :  { %p288_p9 = pnand %p286_p8, %p283_p7 }
 0x157   :  { %291 = shalt.err (!%p288_p9)
}
 0x158   :  { %177 = dma.vmem_to_hbm [thread:$0]  %s175_s17, 128, %s382_s4, [#allocation4]  }
 0x159   :  { %296 = dma.done.wait [#allocation4], 128  }
 0x15a   :  { %297 = vsyncadd [#allocation4], 4294967168 }
 0x15b   :  { %181 = vsyncpa [#allocation3], 1 }
 0x15c   :  { %182 = vsyncpa [#allocation6], 1 }
 0x15d   :  { %183 = vsyncpa [#allocation4], 1 }

</bundles_post_ra>
